<compile_context>
chip_gen: v7x
topology: tpu7x:2x2x1
jax: 0.10.0
libtpu: 0.0.40
codegen_flags: <defaults>
</compile_context>

<pallas_src>
import functools

import jax
import jax.numpy as jnp
from jax.experimental import pallas as pl
from jax.experimental.pallas import tpu as pltpu


def _mapping_kernel(seed_ref, x_ref, w_ref, b_ref, o_ref, acc_ref, *,
                    leak_slope, dropout_p, training):
    # x_ref: (TB, TK)  w_ref: (TK, TN)  b_ref: (1, TN)
    # o_ref: (TB, TN)  acc_ref: (TB, TN) f32 scratch
    k = pl.program_id(2)

    @pl.when(k == 0)
    def _():
        acc_ref[...] = jnp.zeros_like(acc_ref)

    acc_ref[...] += jnp.dot(x_ref[...], w_ref[...],
                            preferred_element_type=jnp.float32)

    @pl.when(k == pl.num_programs(2) - 1)
    def _():
        y = acc_ref[...] + b_ref[...].astype(jnp.float32)  # bias bcast over rows

        # LeakyReLU: max(y, a*y) is exact for 0 < a < 1.
        y = jnp.maximum(y, leak_slope * y)

        if training and dropout_p > 0.0:
            # Per-(i, j)-tile seed so every output tile draws an independent mask.
            pltpu.prng_seed(seed_ref[0]
                            + pl.program_id(0) * pl.num_programs(1)
                            + pl.program_id(1))
            bits = pltpu.bitcast(pltpu.prng_random_bits(y.shape), jnp.uint32)
            # Integer-threshold keep test: no u32->f32 cast / float compare.
            thresh = jnp.uint32(min(int(dropout_p * 4294967296.0), 0xFFFFFFFF))
            keep = bits >= thresh
            y = jnp.where(keep, y * (1.0 / (1.0 - dropout_p)), 0.0)

        o_ref[...] = y.astype(o_ref.dtype)


def _round_up(v, m):
    return (v + m - 1) // m * m


def mapping_block_forward(x, w_t, b, *, leak_slope=0.2, dropout=0.1,
                          training=False, seed=0, tb=256, tn=256, tk=512):
    """Forward of MappingBlock.

    x:   (..., in_dim) float32/bfloat16
    w_t: (in_dim, out_dim)  (PyTorch nn.Linear weight, transposed once here)
    b:   (out_dim,)
    """
    orig_shape = x.shape
    K = orig_shape[-1]
    N = w_t.shape[1]
    x2 = x.reshape(-1, K)
    B = x2.shape[0]

    # Tile sizes: batch tile multiple of 8 (sublanes), out tile multiple of
    # 128 (lanes).  K is either a single full-extent block (small in_dim) or
    # tiled in multiples of 128 with an accumulator (large in_dim).
    TB = min(_round_up(B, 8), tb)
    TN = min(_round_up(N, 128), tn)
    if K <= max(tk, 1024):
        TK, K_pad = K, K
    else:
        TK = tk
        K_pad = _round_up(K, TK)
    B_pad = _round_up(B, TB)
    N_pad = _round_up(N, TN)

    xp = x2 if (B_pad == B and K_pad == K) else jnp.pad(
        x2, ((0, B_pad - B), (0, K_pad - K)))
    wp = w_t if (N_pad == N and K_pad == K) else jnp.pad(
        w_t, ((0, K_pad - K), (0, N_pad - N)))
    bp = (b if N_pad == N else jnp.pad(b, (0, N_pad - N))).reshape(1, N_pad)
    seed_arr = jnp.asarray([seed], dtype=jnp.int32)

    kernel = functools.partial(
        _mapping_kernel,
        leak_slope=float(leak_slope),
        dropout_p=float(dropout),
        training=bool(training),
    )

    grid = (B_pad // TB, N_pad // TN, K_pad // TK)

    # Double-buffered per-step VMEM footprint (f32 upper bound) + accumulator
    # scratch + headroom, capped below the v7x scoped default.
    itemsize = 4
    vmem_needed = (2 * itemsize * (TB * TK + TK * TN + TN + TB * TN)
                   + itemsize * TB * TN)
    vmem_limit = int(min(60 * 1024 * 1024,
                         max(32 * 1024 * 1024, 2 * vmem_needed)))

    cost = pl.CostEstimate(
        flops=2 * B_pad * K_pad * N_pad,
        transcendentals=0,
        bytes_accessed=itemsize * (B_pad * K_pad + K_pad * N_pad
                                   + N_pad + B_pad * N_pad),
    )

    out = pl.pallas_call(
        kernel,
        out_shape=jax.ShapeDtypeStruct((B_pad, N_pad), x.dtype),
        grid_spec=pltpu.PrefetchScalarGridSpec(
            num_scalar_prefetch=1,                   # dropout seed lands in SMEM
            grid=grid,
            in_specs=[
                pl.BlockSpec((TB, TK), lambda i, j, k, s: (i, k)),   # x tile
                pl.BlockSpec((TK, TN), lambda i, j, k, s: (k, j)),   # W tile
                pl.BlockSpec((1, TN), lambda i, j, k, s: (0, j)),    # bias tile
            ],
            out_specs=pl.BlockSpec((TB, TN), lambda i, j, k, s: (i, j)),
            scratch_shapes=[pltpu.VMEM((TB, TN), jnp.float32)],
        ),
        compiler_params=pltpu.CompilerParams(
            dimension_semantics=("parallel", "parallel", "arbitrary"),
            vmem_limit_bytes=vmem_limit,
        ),
        cost_estimate=cost,
    )(seed_arr, xp, wp, bp)

    if B_pad != B or N_pad != N:
        out = out[:B, :N]
    return out.reshape(orig_shape[:-1] + (N,))


def init_params(key, in_dim, out_dim):
    """PyTorch-style init: kaiming_normal_ defaults (a=0, fan_in, leaky_relu)
    -> std = sqrt(2 / fan_in); bias zeroed."""
    std = (2.0 / in_dim) ** 0.5
    w = jax.random.normal(key, (out_dim, in_dim), dtype=jnp.float32) * std
    b = jnp.zeros((out_dim,), dtype=jnp.float32)
    return w, b


if __name__ == "__main__":
    in_dim, out_dim = 32, 64
    batch = 8

    key = jax.random.PRNGKey(0)
    kx, kw = jax.random.split(key)
    x = jax.random.normal(kx, (batch, in_dim), dtype=jnp.float32)
    w, b = init_params(kw, in_dim, out_dim)        # PyTorch layout (out, in)
    w_t = w.T                                      # kernel layout (in, out)

    # Eval-mode forward (dropout = identity), matching module.eval().
    out = mapping_block_forward(x, w_t, b, leak_slope=0.2, dropout=0.1,
                                training=False)
    jax.block_until_ready(out)
    assert out.shape == (batch, out_dim)

    # Reference check in plain JAX (eval mode).
    ref = x @ w_t + b[None, :]
    ref = jnp.where(ref >= 0, ref, 0.2 * ref)
    assert jnp.allclose(out, ref, atol=1e-5, rtol=1e-5), "mismatch vs reference"

    # NOTE: training-mode dropout uses the TPU hardware PRNG
    # (pltpu.prng_seed / prng_random_bits), which only lowers on real TPU
    # hardware (no CPU-interpret lowering), so it is not exercised here.
    print("KERNEL_OK")
</pallas_src>

<mosaic_0001>
module attributes {stable_mosaic.version = 11 : i64} {
  func.func @_mapping_kernel(%arg0: i32, %arg1: i32, %arg2: i32, %arg3: memref<1xi32, #tpu.memory_space<smem>>, %arg4: memref<8x32xf32, #tpu.memory_space<vmem>>, %arg5: memref<32x128xf32, #tpu.memory_space<vmem>>, %arg6: memref<1x128xf32, #tpu.memory_space<vmem>>, %arg7: memref<8x128xf32, #tpu.memory_space<vmem>>, %arg8: memref<8x128xf32, #tpu.memory_space<vmem>>) attributes {dimension_semantics = [#tpu.dimension_semantics<parallel>, #tpu.dimension_semantics<parallel>, #tpu.dimension_semantics<arbitrary>], iteration_bounds = array<i64: 1, 1, 1>, scalar_prefetch = 1 : i64, scratch_operands = 1 : i64, tpu.core_type = #tpu.core_type<tc>, window_params = [{transform_indices = @transform_0, window_bounds = array<i64: 8, 32>}, {transform_indices = @transform_1, window_bounds = array<i64: 32, 128>}, {transform_indices = @transform_2, window_bounds = array<i64: 1, 128>}, {transform_indices = @transform_3, window_bounds = array<i64: 8, 128>}]} {
    %c0_i32 = arith.constant 0 : i32
    %0 = arith.cmpi eq, %arg2, %c0_i32 : i32
    %1 = arith.extui %0 : i1 to i32
    %c0_i32_0 = arith.constant 0 : i32
    %2 = arith.cmpi ne, %1, %c0_i32_0 : i32
    scf.if %2 {
      %cst_10 = arith.constant 0.000000e+00 : f32
      %12 = vector.broadcast %cst_10 : f32 to vector<8x128xf32>
      %c0_11 = arith.constant 0 : index
      %c0_12 = arith.constant 0 : index
      %13 = vector.load %arg8[%c0_11, %c0_12] : memref<8x128xf32, #tpu.memory_space<vmem>>, vector<8x128xf32>
      tpu.vector_store %arg8[%c0_11, %c0_12], %12 {strides = array<i32>} : memref<8x128xf32, #tpu.memory_space<vmem>>, vector<8x128xf32>,
    } else {
    }
    %c0 = arith.constant 0 : index
    %c0_1 = arith.constant 0 : index
    %3 = vector.load %arg8[%c0, %c0_1] : memref<8x128xf32, #tpu.memory_space<vmem>>, vector<8x128xf32>
    %c0_2 = arith.constant 0 : index
    %c0_3 = arith.constant 0 : index
    %4 = vector.load %arg4[%c0_2, %c0_3] : memref<8x32xf32, #tpu.memory_space<vmem>>, vector<8x32xf32>
    %c0_4 = arith.constant 0 : index
    %c0_5 = arith.constant 0 : index
    %5 = vector.load %arg5[%c0_4, %c0_5] : memref<32x128xf32, #tpu.memory_space<vmem>>, vector<32x128xf32>
    %cst = arith.constant dense<0.000000e+00> : vector<8x128xf32>
    %6 = tpu.matmul %4, %5, %cst {dimension_numbers = #tpu.dot_dimension_numbers<[1], [0], [0], [1], [0, 0, 1, 1], [], []>} : vector<8x32xf32>, vector<32x128xf32>, vector<8x128xf32> -> vector<8x128xf32>
    %7 = arith.addf %3, %6 : vector<8x128xf32>
    %c0_6 = arith.constant 0 : index
    %c0_7 = arith.constant 0 : index
    %8 = vector.load %arg8[%c0_6, %c0_7] : memref<8x128xf32, #tpu.memory_space<vmem>>, vector<8x128xf32>
    tpu.vector_store %arg8[%c0_6, %c0_7], %7 {strides = array<i32>} : memref<8x128xf32, #tpu.memory_space<vmem>>, vector<8x128xf32>,
    %c0_i32_8 = arith.constant 0 : i32
    %9 = arith.cmpi eq, %arg2, %c0_i32_8 : i32
    %10 = arith.extui %9 : i1 to i32
    %c0_i32_9 = arith.constant 0 : i32
    %11 = arith.cmpi ne, %10, %c0_i32_9 : i32
    scf.if %11 {
      %c0_10 = arith.constant 0 : index
      %c0_11 = arith.constant 0 : index
      %12 = vector.load %arg8[%c0_10, %c0_11] : memref<8x128xf32, #tpu.memory_space<vmem>>, vector<8x128xf32>
      %c0_12 = arith.constant 0 : index
      %c0_13 = arith.constant 0 : index
      %13 = vector.load %arg6[%c0_12, %c0_13] : memref<1x128xf32, #tpu.memory_space<vmem>>, vector<1x128xf32>
      %14 = vector.broadcast %13 : vector<1x128xf32> to vector<8x128xf32>
      %15 = arith.addf %12, %14 : vector<8x128xf32>
      %cst_14 = arith.constant 2.000000e-01 : f32
      %16 = vector.broadcast %cst_14 : f32 to vector<8x128xf32>
      %17 = arith.mulf %16, %15 : vector<8x128xf32>
      %18 = arith.maximumf %15, %17 : vector<8x128xf32>
      %c0_15 = arith.constant 0 : index
      %c0_16 = arith.constant 0 : index
      %19 = vector.load %arg7[%c0_15, %c0_16] : memref<8x128xf32, #tpu.memory_space<vmem>>, vector<8x128xf32>
      tpu.vector_store %arg7[%c0_15, %c0_16], %18 {strides = array<i32>} : memref<8x128xf32, #tpu.memory_space<vmem>>, vector<8x128xf32>,
    } else {
    }
    return
  }
  func.func @transform_0(%arg0: i32, %arg1: i32, %arg2: i32, %arg3: memref<1xi32, #tpu.memory_space<smem>>) -> (i32, i32) {
    %c0_i32 = arith.constant 0 : i32
    return %arg0, %arg2 : i32, i32
  }
  func.func @transform_1(%arg0: i32, %arg1: i32, %arg2: i32, %arg3: memref<1xi32, #tpu.memory_space<smem>>) -> (i32, i32) {
    %c0_i32 = arith.constant 0 : i32
    return %arg2, %arg1 : i32, i32
  }
  func.func @transform_2(%arg0: i32, %arg1: i32, %arg2: i32, %arg3: memref<1xi32, #tpu.memory_space<smem>>) -> (i32, i32) {
    %c0_i32 = arith.constant 0 : i32
    %c0_i32_0 = arith.constant 0 : i32
    return %c0_i32, %arg1 : i32, i32
  }
  func.func @transform_3(%arg0: i32, %arg1: i32, %arg2: i32, %arg3: memref<1xi32, #tpu.memory_space<smem>>) -> (i32, i32) {
    %c0_i32 = arith.constant 0 : i32
    return %arg0, %arg1 : i32, i32
  }
}

</mosaic_0001>

<bundles_post_ra>
// kernel: tpu_custom_call.1
= control target key start
LH: loop header
LB: loop body
LE: loop exit
PB: predicated region body
PF: predicated region fallthrough
CT: control target
= control target key end

     0   :  { %10 = vsyncpa [#allocation6], 0  ;;  %s344_s0 = inlined_call_operand.<no memory space> [shape: s32[1], index: 0, kind: input, shape index: {}]   ;;  %s345_s1 = inlined_call_operand.hbm [shape: f32[8,32], index: 1, kind: input, shape index: {}]   ;;  %s346_s2 = inlined_call_operand.hbm [shape: f32[32,128], index: 2, kind: input, shape index: {}]   ;;  %s347_s3 = inlined_call_operand.vmem [shape: f32[1,128], index: 3, kind: input, shape index: {}]   ;;  %s348_s4 = inlined_call_operand.hbm [shape: f32[8,128], index: 4, kind: output, shape index: {}]  }
   0x1   :  { %11 = vsyncpa [#allocation9], 0 }
   0x2   :  { %12 = vsyncpa [#allocation7], 0  ;;  %s265_s15 = smov [#allocation5]   ;;  %s266_s17 = smov [#allocation8]  }
   0x3   :  { %s19_s16 = sshll.u32 %s265_s15, 4  ;;  %s28_s18 = sshll.u32 %s266_s17, 4  ;;  %s20_s16 = int_to_ptr.vmem [resolvable:$true] %s19_s16  ;;  %s298_s18 = int_to_ptr.vmem [resolvable:$true] %s28_s18 }
   0x4   :  { %s193_s20 = scalar_lea.hbm %s345_s1, 128 }
   0x5   :  { %p194_p0 = scmp.ne.s32.totalorder %s345_s1, %s193_s20  ;;  %p197_p1 = scmp.lt.u32.totalorder %s193_s20, %s345_s1 }
   0x7   :  { %p199_p2 = pnand %p197_p1, %p194_p0 }
   0x9   :  { %202 = shalt.err (!%p199_p2)
}
   0xa   :  { %s203_s25 = scalar_lea.vmem %s20_s16, 128  ;;  %p208_p4 = scmp.lt.s32.totalorder %s20_s16, %s20_s16 }
   0xb   :  { %p204_p3 = scmp.ne.s32.totalorder %s20_s16, %s203_s25  ;;  %p209_p5 = scmp.lt.s32.totalorder %s203_s25, %s203_s25 }
   0xd   :  { %p210_p6 = por %p209_p5, %p208_p4 }
   0xf   :  { %p211_p7 = pnand %p210_p6, %p204_p3 }
  0x11   :  { %214 = shalt.err (!%p211_p7)
}
  0x12   :  { %22 = dma.hbm_to_vmem [thread:$0]  %s345_s1, 128, %s20_s16, [#allocation6]  }
  0x13   :  { %s215_s30 = scalar_lea.hbm %s346_s2, 512 }
  0x14   :  { %p216_p8 = scmp.ne.s32.totalorder %s346_s2, %s215_s30  ;;  %p219_p9 = scmp.lt.u32.totalorder %s215_s30, %s346_s2 }
  0x16   :  { %p221_p10 = pnand %p219_p9, %p216_p8 }
  0x18   :  { %224 = shalt.err (!%p221_p10)
}
  0x19   :  { %s225_s9 = scalar_lea.vmem %s298_s18, 512  ;;  %p230_p12 = scmp.lt.s32.totalorder %s298_s18, %s298_s18 }
  0x1a   :  { %p226_p11 = scmp.ne.s32.totalorder %s298_s18, %s225_s9  ;;  %p231_p13 = scmp.lt.s32.totalorder %s225_s9, %s225_s9 }
  0x1c   :  { %p232_p0 = por %p231_p13, %p230_p12 }
  0x1e   :  { %p233_p1 = pnand %p232_p0, %p226_p11 }
  0x20   :  { %236 = shalt.err (!%p233_p1)
}
  0x21   :  { %s267_s1 = smov 128   ;;  %s268_s10 = smov 8  }
  0x22   :  { %34 = dma.hbm_to_vmem [thread:$0]  %s346_s2, 512, %s298_s18, [#allocation9], %s267_s1, %s267_s1, %s268_s10  }
  0x23   :  { %259 = dma.done.wait [#allocation6], 128  }
  0x24   :  { %260 = vsyncadd [#allocation6], 4294967168 }
  0x25   :  { %261 = dma.done.wait [#allocation9], 512  }
  0x26   :  { %262 = vsyncadd [#allocation9], 4294966784  ;;  %v269_v0 = vmov 0.0|0.0   ;;  %vm270_vm0 = vmmov 0   ;;  %v271_v1 = vmov 0.0   ;;  %v50_v2 = vld [vmem:[#allocation8] sm:$0xff] }
  0x27   :  { %179 = vmatprep.subr.bf16.mxu0 %v269_v0  ;;  %176 = vmatprep.mubr.msk.f32.mxu0 %vm270_vm0, %v271_v1  ;;  %v51_v3 = vld [vmem:[#allocation8 + $0x8] sm:$0xff]  ;;  %v52_v4 = vld [vmem:[#allocation8 + $0x10] sm:$0xff]  ;;  %v53_v6 = vld [vmem:[#allocation8 + $0x18] sm:$0xff]  ;;  %vm54_vm1 = vcmask 261120   ;;  %s272_s14 = smov [#allocation10]  }
  0x28   :  { %v180_v5 = vpack.c.bf16 %v51_v3, %v50_v2  ;;  %v183_v7 = vpack.c.bf16 %v53_v6, %v52_v4  ;;  %v49_v8 = vld [vmem:[#allocation5] sm:$0xff]  ;;  %s151_s15 = sshll.u32 %s272_s14, 4  ;;  %s152_s15 = int_to_ptr.vmem [resolvable:$true] %s151_s15 }
  0x29   :  { %v162_v9 = vld [vmem:[%s347_s3] ss:$0 sm:$0xff]  ;;  %s237_s16 = scalar_lea.vmem %s152_s15, 128  ;;  %p242_p3 = scmp.lt.s32.totalorder %s152_s15, %s152_s15 }
  0x2a   :  { %181 = vmatpush3.bf16.msra.mxu0 %v180_v5  ;;  %p238_p2 = scmp.ne.s32.totalorder %s152_s15, %s237_s16  ;;  %p243_p4 = scmp.lt.s32.totalorder %s237_s16, %s237_s16 }
  0x2b   :  { %182 = vmatprep.subr.bf16.mxu0 %v269_v0 }
  0x2c   :  { %p244_p5 = por %p243_p4, %p242_p3 }
  0x2e   :  { %184 = vmatpush3.bf16.msra.mxu0 %v183_v7  ;;  %p245_p6 = pnand %p244_p5, %p238_p2 }
  0x31   :  { %177 = vmatmul.mubr.msk.f32.vlgmr.msra.gmra.mrb[0].mxu0 %vm54_vm1, %v49_v8 }
 0x104   :  { %v124_v10 = vpop.f32.mrb[0].mxu0 }
 0x105   :  { %v141_v11 = vadd.f32 %v162_v9, %v124_v10  ;;  %v178_v12 = vpop.f32.mrb[1].mxu0 }
 0x107   :  { %v142_v13 = vmul.f32 0.2, %v141_v11 }
 0x109   :  { %v143_v14 = vmax.f32 %v141_v11, %v142_v13 }
 0x10b   :  { %144 = vst [vmem:[#allocation10] sm:$0xff] %v143_v14 }
 0x10c   :  { %248 = shalt.err (!%p245_p6)
}
 0x10d   :  { %s249_s3 = scalar_lea.hbm %s348_s4, 128 }
 0x10e   :  { %p250_p7 = scmp.ne.s32.totalorder %s348_s4, %s249_s3  ;;  %p253_p8 = scmp.lt.u32.totalorder %s249_s3, %s348_s4 }
 0x110   :  { %p255_p9 = pnand %p253_p8, %p250_p7 }
 0x112   :  { %258 = shalt.err (!%p255_p9)
}
 0x113   :  { %154 = dma.vmem_to_hbm [thread:$0]  %s152_s15, 128, %s348_s4, [#allocation7]  }
 0x114   :  { %263 = dma.done.wait [#allocation7], 128  }
 0x115   :  { %264 = vsyncadd [#allocation7], 4294967168 }
 0x116   :  { %158 = vsyncpa [#allocation6], 1 }
 0x117   :  { %159 = vsyncpa [#allocation9], 1 }
 0x118   :  { %160 = vsyncpa [#allocation7], 1 }

</bundles_post_ra>
